<compile_context>
chip_gen: v7x
topology: tpu7x:2x2x1
jax: 0.10.0
libtpu: 0.0.40
codegen_flags: <defaults>
</compile_context>

<pallas_src>
import jax
import jax.numpy as jnp
from jax.experimental import pallas as pl
from jax.experimental.pallas import tpu as pltpu


def tv_loss(x, tv_loss_weight=1.0):
    """TVLoss.forward equivalent. x: (B, C, H, W), any float dtype."""
    B, C, H, W = x.shape
    N = B * C
    L = H * W

    # Lane-dense flattened view: (N, H*W).  Pure metadata reshape in XLA.
    xf = x.reshape(N, L)

    # 0/1 masks (f32) that zero out the wrap-around terms of the rolls:
    #   mask_w: drop positions in the last column (w == W-1)
    #   mask_h: drop positions in the last row    (h == H-1)
    idx = jnp.arange(L, dtype=jnp.int32)
    mask_w = ((idx % W) != (W - 1)).astype(jnp.float32).reshape(1, L)
    mask_h = (idx < (H - 1) * W).astype(jnp.float32).reshape(1, L)

    # Pick the biggest block (rows of the flattened view) that fits the budget.
    budget_bytes = 8 * 1024 * 1024          # per block; x2 for double-buffering
    itemsize = x.dtype.itemsize
    if N * L * itemsize <= budget_bytes:
        TN = N                               # whole tensor in one block
    else:
        max_rows = max(1, budget_bytes // (L * itemsize))
        TN = 1
        for d in range(min(N, max_rows), 0, -1):
            # keep the second-minor block dim a multiple of 8 (or 1 / full)
            if N % d == 0 and (d % 8 == 0 or d == 1):
                TN = d
                break
    G = N // TN
    # TODO(synk): for extremely large single images (one row > budget) the
    # flattened spatial axis would also need tiling (with halo handling).

    def kernel(x_ref, mh_ref, mw_ref, h_ref, w_ref):
        xb = x_ref[...].astype(jnp.float32)                 # (TN, L)
        # neighbor one step to the right (next column): result[p] = x[p+1]
        x_right = pltpu.roll(xb, shift=L - 1, axis=1)
        # neighbor W steps ahead (next row):           result[p] = x[p+W]
        x_down = pltpu.roll(xb, shift=L - W, axis=1)
        dw = (x_right - xb) * mw_ref[...]
        dh = (x_down - xb) * mh_ref[...]
        # per-program partial sums -> own SMEM output slot (grid is parallel)
        h_ref[0, 0] = jnp.sum(dh * dh)
        w_ref[0, 0] = jnp.sum(dw * dw)

    h_parts, w_parts = pl.pallas_call(
        kernel,
        out_shape=(
            jax.ShapeDtypeStruct((G, 1), jnp.float32),
            jax.ShapeDtypeStruct((G, 1), jnp.float32),
        ),
        grid_spec=pltpu.PrefetchScalarGridSpec(
            num_scalar_prefetch=0,
            grid=(G,),
            in_specs=[
                pl.BlockSpec((TN, L), lambda i: (i, 0)),     # image rows
                pl.BlockSpec((1, L), lambda i: (0, 0)),      # mask_h (tiny)
                pl.BlockSpec((1, L), lambda i: (0, 0)),      # mask_w (tiny)
            ],
            out_specs=[
                pl.BlockSpec((1, 1), lambda i: (i, 0), memory_space=pltpu.SMEM),
                pl.BlockSpec((1, 1), lambda i: (i, 0), memory_space=pltpu.SMEM),
            ],
        ),
        compiler_params=pltpu.CompilerParams(
            dimension_semantics=("parallel",),               # disjoint outputs
            vmem_limit_bytes=32 * 1024 * 1024,
        ),
    )(xf, mask_h, mask_w)

    h_tv = jnp.sum(h_parts)
    w_tv = jnp.sum(w_parts)

    count_h = C * (H - 1) * W
    count_w = C * H * (W - 1)
    return tv_loss_weight * 2.0 * (h_tv / count_h + w_tv / count_w) / B


def tv_loss_ref(x, tv_loss_weight=1.0):
    """Pure-JAX reference matching the PyTorch forward exactly."""
    B, C, H, W = x.shape
    xf = x.astype(jnp.float32)
    count_h = C * (H - 1) * W
    count_w = C * H * (W - 1)
    h_tv = jnp.sum((xf[:, :, 1:, :] - xf[:, :, : H - 1, :]) ** 2)
    w_tv = jnp.sum((xf[:, :, :, 1:] - xf[:, :, :, : W - 1]) ** 2)
    return tv_loss_weight * 2.0 * (h_tv / count_h + w_tv / count_w) / B


if __name__ == "__main__":
    key = jax.random.PRNGKey(0)

    # primary test shape (matches the module's NCHW expectation)
    B, C, H, W = 2, 4, 16, 16
    x = jax.random.normal(key, (B, C, H, W), dtype=jnp.float32)
    out = tv_loss(x, tv_loss_weight=1.0)
    out = jax.block_until_ready(out)
    ref = tv_loss_ref(x, tv_loss_weight=1.0)
    assert jnp.allclose(out, ref, rtol=1e-5, atol=1e-5), (out, ref)

    # extra shape with H != W to exercise the asymmetric counts
    x2 = jax.random.normal(jax.random.PRNGKey(1), (2, 3, 8, 16), dtype=jnp.float32)
    out2 = jax.block_until_ready(tv_loss(x2, tv_loss_weight=0.5))
    ref2 = tv_loss_ref(x2, tv_loss_weight=0.5)
    assert jnp.allclose(out2, ref2, rtol=1e-5, atol=1e-5), (out2, ref2)

    print("KERNEL_OK")
</pallas_src>

<mosaic_0001>
module attributes {stable_mosaic.version = 11 : i64} {
  func.func @kernel(%arg0: i32, %arg1: memref<8x256xf32, #tpu.memory_space<vmem>>, %arg2: memref<1x256xf32, #tpu.memory_space<vmem>>, %arg3: memref<1x256xf32, #tpu.memory_space<vmem>>, %arg4: memref<1x1xf32, #tpu.memory_space<smem>>, %arg5: memref<1x1xf32, #tpu.memory_space<smem>>) attributes {dimension_semantics = [#tpu.dimension_semantics<parallel>], iteration_bounds = array<i64: 1>, scalar_prefetch = 0 : i64, scratch_operands = 0 : i64, tpu.core_type = #tpu.core_type<tc>, window_params = [{transform_indices = @transform_0, window_bounds = array<i64: 8, 256>}, {pipeline_mode = #tpu.pipeline_mode<synchronous>, transform_indices = @transform_1, window_bounds = array<i64: 1, 256>}, {pipeline_mode = #tpu.pipeline_mode<synchronous>, transform_indices = @transform_2, window_bounds = array<i64: 1, 256>}, {transform_indices = @transform_3, window_bounds = array<i64: 1, 1>}, {transform_indices = @transform_4, window_bounds = array<i64: 1, 1>}]} {
    %c0 = arith.constant 0 : index
    %c0_0 = arith.constant 0 : index
    %0 = vector.load %arg1[%c0, %c0_0] : memref<8x256xf32, #tpu.memory_space<vmem>>, vector<8x256xf32>
    %c255_i32 = arith.constant 255 : i32
    %1 = tpu.dynamic_rotate %0 by %c255_i32 dim 1 : vector<8x256xf32>, i32 -> vector<8x256xf32>
    %c240_i32 = arith.constant 240 : i32
    %2 = tpu.dynamic_rotate %0 by %c240_i32 dim 1 : vector<8x256xf32>, i32 -> vector<8x256xf32>
    %3 = arith.subf %1, %0 : vector<8x256xf32>
    %c0_1 = arith.constant 0 : index
    %c0_2 = arith.constant 0 : index
    %4 = vector.load %arg3[%c0_1, %c0_2] : memref<1x256xf32, #tpu.memory_space<vmem>>, vector<1x256xf32>
    %5 = vector.broadcast %4 : vector<1x256xf32> to vector<8x256xf32>
    %6 = arith.mulf %3, %5 : vector<8x256xf32>
    %7 = arith.subf %2, %0 : vector<8x256xf32>
    %c0_3 = arith.constant 0 : index
    %c0_4 = arith.constant 0 : index
    %8 = vector.load %arg2[%c0_3, %c0_4] : memref<1x256xf32, #tpu.memory_space<vmem>>, vector<1x256xf32>
    %9 = vector.broadcast %8 : vector<1x256xf32> to vector<8x256xf32>
    %10 = arith.mulf %7, %9 : vector<8x256xf32>
    %11 = arith.mulf %10, %10 : vector<8x256xf32>
    %12 = vector.shape_cast %11 : vector<8x256xf32> to vector<1x8x256xf32>
    %cst = arith.constant dense<0.000000e+00> : vector<1xf32>
    %13 = vector.multi_reduction <add>, %12, %cst [1, 2] : vector<1x8x256xf32> to vector<1xf32>
    %14 = vector.shape_cast %13 : vector<1xf32> to vector<1x1x1xf32>
    %15 = vector.extract %14[0, 0, 0] : f32 from vector<1x1x1xf32>
    %c0_5 = arith.constant 0 : index
    %c0_6 = arith.constant 0 : index
    %16 = memref.load %arg4[%c0_5, %c0_6] : memref<1x1xf32, #tpu.memory_space<smem>>
    memref.store %15, %arg4[%c0_5, %c0_6] : memref<1x1xf32, #tpu.memory_space<smem>>
    %17 = arith.mulf %6, %6 : vector<8x256xf32>
    %18 = vector.shape_cast %17 : vector<8x256xf32> to vector<1x8x256xf32>
    %cst_7 = arith.constant dense<0.000000e+00> : vector<1xf32>
    %19 = vector.multi_reduction <add>, %18, %cst_7 [1, 2] : vector<1x8x256xf32> to vector<1xf32>
    %20 = vector.shape_cast %19 : vector<1xf32> to vector<1x1x1xf32>
    %21 = vector.extract %20[0, 0, 0] : f32 from vector<1x1x1xf32>
    %c0_8 = arith.constant 0 : index
    %c0_9 = arith.constant 0 : index
    %22 = memref.load %arg5[%c0_8, %c0_9] : memref<1x1xf32, #tpu.memory_space<smem>>
    memref.store %21, %arg5[%c0_8, %c0_9] : memref<1x1xf32, #tpu.memory_space<smem>>
    return
  }
  func.func @transform_0(%arg0: i32) -> (i32, i32) {
    %c0_i32 = arith.constant 0 : i32
    %c0_i32_0 = arith.constant 0 : i32
    return %arg0, %c0_i32 : i32, i32
  }
  func.func @transform_1(%arg0: i32) -> (i32, i32) {
    %c0_i32 = arith.constant 0 : i32
    %c0_i32_0 = arith.constant 0 : i32
    %c0_i32_1 = arith.constant 0 : i32
    return %c0_i32, %c0_i32_0 : i32, i32
  }
  func.func @transform_2(%arg0: i32) -> (i32, i32) {
    %c0_i32 = arith.constant 0 : i32
    %c0_i32_0 = arith.constant 0 : i32
    %c0_i32_1 = arith.constant 0 : i32
    return %c0_i32, %c0_i32_0 : i32, i32
  }
  func.func @transform_3(%arg0: i32) -> (i32, i32) {
    %c0_i32 = arith.constant 0 : i32
    %c0_i32_0 = arith.constant 0 : i32
    return %arg0, %c0_i32 : i32, i32
  }
  func.func @transform_4(%arg0: i32) -> (i32, i32) {
    %c0_i32 = arith.constant 0 : i32
    %c0_i32_0 = arith.constant 0 : i32
    return %arg0, %c0_i32 : i32, i32
  }
}

</mosaic_0001>

<bundles_post_ra>
// kernel: tpu_custom_call.1
= control target key start
LH: loop header
LB: loop body
LE: loop exit
PB: predicated region body
PF: predicated region fallthrough
CT: control target
= control target key end

     0   :  { %10 = vsyncpa [#allocation3], 0  ;;  %s263_s0 = inlined_call_operand.hbm [shape: f32[8,256], index: 0, kind: input, shape index: {}]   ;;  %s264_s1 = inlined_call_operand.vmem [shape: f32[1,256], index: 1, kind: input, shape index: {}]   ;;  %s265_s2 = inlined_call_operand.vmem [shape: f32[1,256], index: 2, kind: input, shape index: {}]   ;;  %s266_s3 = inlined_call_operand.hbm [shape: f32[1,1], index: 3, kind: output, shape index: {0}]   ;;  %s267_s4 = inlined_call_operand.hbm [shape: f32[1,1], index: 4, kind: output, shape index: {1}]  }
   0x1   :  { %11 = vsyncpa [#allocation4], 0 }
   0x2   :  { %12 = vsyncpa [#allocation7], 0  ;;  %s191_s15 = smov [#allocation2]   ;;  %s143_s19 = scalar_lea.hbm %s263_s0, 256 }
   0x3   :  { %s19_s16 = sshll.u32 %s191_s15, 4  ;;  %p144_p0 = scmp.ne.s32.totalorder %s263_s0, %s143_s19  ;;  %s20_s16 = int_to_ptr.vmem [resolvable:$true] %s19_s16 }
   0x4   :  { %p147_p1 = scmp.lt.u32.totalorder %s143_s19, %s263_s0 }
   0x6   :  { %p149_p2 = pnand %p147_p1, %p144_p0 }
   0x8   :  { %152 = shalt.err (!%p149_p2)
}
   0x9   :  { %s153_s24 = scalar_lea.vmem %s20_s16, 256  ;;  %p158_p4 = scmp.lt.s32.totalorder %s20_s16, %s20_s16 }
   0xa   :  { %p154_p3 = scmp.ne.s32.totalorder %s20_s16, %s153_s24  ;;  %p159_p5 = scmp.lt.s32.totalorder %s153_s24, %s153_s24 }
   0xc   :  { %p160_p6 = por %p159_p5, %p158_p4 }
   0xe   :  { %p161_p7 = pnand %p160_p6, %p154_p3 }
  0x10   :  { %164 = shalt.err (!%p161_p7)
}
  0x11   :  { %22 = dma.hbm_to_vmem [thread:$0]  %s263_s0, 256, %s20_s16, [#allocation3]  }
  0x12   :  { %185 = dma.done.wait [#allocation3], 256  }
  0x13   :  { %186 = vsyncadd [#allocation3], 4294967040  ;;  %v30_v0 = vld [vmem:[#allocation2] sm:$0xff]  ;;  %s192_s27 = smov 112   ;;  %s193_s28 = smov 127   ;;  %v31_v1 = vld [vmem:[#allocation2 + $0x8] sm:$0xff]  ;;  %v36_v2 = vlaneseq }
  0x14   :  { %41 = vrot.lane.b32.xlu1 %v30_v0, %s192_s27  ;;  %32 = vrot.lane.b32.xlu0 %v30_v0, %s193_s28  ;;  %v66_v9 = vld [vmem:[%s264_s1] sm:$0x3]  ;;  %s165_s8 = scalar_lea.hbm %s266_s3, 16 }
  0x15   :  { %v53_v3 = vshrl.u32 %v36_v2, 7  ;;  %v37_v4 = vand.u32 127, %v36_v2  ;;  %v50_v10 = vld [vmem:[%s265_s2] sm:$0x3]  ;;  %p166_p8 = scmp.ne.s32.totalorder %s266_s3, %s165_s8  ;;  %p169_p9 = scmp.lt.u32.totalorder %s165_s8, %s266_s3 }
  0x17   :  { %v54_v7 = vsub.s32 0, %v53_v3  ;;  %v58_v8 = vsub.s32 1, %v53_v3  ;;  %vm45_vm0 = vcmp.lt.s32.totalorder %v37_v4, 112  ;;  %vm38_vm1 = vcmp.lt.s32.totalorder %v37_v4, 127  ;;  %p171_p10 = pnand %p169_p9, %p166_p8 }
  0x18   :  { %43 = vrot.lane.b32.xlu1 %v31_v1, %s192_s27  ;;  %34 = vrot.lane.b32.xlu0 %v31_v1, %s193_s28 }
  0x19   :  { %v71_v13 = vrot.slane %v66_v9, %v54_v7  ;;  %v75_v14 = vrot.slane %v66_v9, %v58_v8  ;;  %v55_v15 = vrot.slane %v50_v10, %v54_v7  ;;  %v59_v16 = vrot.slane %v50_v10, %v58_v8 }
  0x86   :  { %v42_v5 = vpop.permute.xlu1 %41  ;;  %v33_v6 = vpop.permute.xlu0 %32 }
  0x8a   :  { %v44_v11 = vpop.permute.xlu1 %43  ;;  %v35_v12 = vpop.permute.xlu0 %34 }
  0x8b   :  { %v46_v17 = vsel %vm45_vm0, %v42_v5, %v44_v11  ;;  %v47_v18 = vsel %vm45_vm0, %v44_v11, %v42_v5  ;;  %v39_v19 = vsel %vm38_vm1, %v33_v6, %v35_v12  ;;  %v40_v20 = vsel %vm38_vm1, %v35_v12, %v33_v6 }
  0x8c   :  { %v64_v21 = vsub.f32 %v46_v17, %v30_v0  ;;  %v65_v22 = vsub.f32 %v47_v18, %v31_v1  ;;  %v48_v23 = vsub.f32 %v39_v19, %v30_v0  ;;  %v49_v24 = vsub.f32 %v40_v20, %v31_v1 }
  0x8e   :  { %v78_v25 = vmul.f32 %v71_v13, %v64_v21  ;;  %v79_v26 = vmul.f32 %v75_v14, %v65_v22  ;;  %v62_v27 = vmul.f32 %v55_v15, %v48_v23  ;;  %v63_v28 = vmul.f32 %v59_v16, %v49_v24 }
  0x90   :  { %v80_v29 = vmul.f32 %v78_v25, %v78_v25  ;;  %v81_v30 = vmul.f32 %v79_v26, %v79_v26  ;;  %v94_v31 = vmul.f32 %v62_v27, %v62_v27  ;;  %v95_v32 = vmul.f32 %v63_v28, %v63_v28 }
  0x92   :  { %v82_v33 = vadd.f32 %v81_v30, %v80_v29  ;;  %v96_v34 = vadd.f32 %v95_v32, %v94_v31 }
  0x94   :  { %83 = vadd.xlane.f32.xlu0 %v82_v33  ;;  %97 = vadd.xlane.f32.xlu1 %v96_v34 }
 0x121   :  { %v98_v35 = vpop.xlane.xlu1 %97  ;;  %v84_v36 = vpop.xlane.xlu0 %83 }
 0x122   :  { %v99_v37 = vrot.slane %v98_v35, 4  ;;  %v85_v38 = vrot.slane %v84_v36, 4 }
 0x124   :  { %v100_v39 = vadd.f32 %v99_v37, %v98_v35  ;;  %v86_v40 = vadd.f32 %v85_v38, %v84_v36 }
 0x126   :  { %v101_v41 = vrot.slane %v100_v39, 2  ;;  %v87_v42 = vrot.slane %v86_v40, 2 }
 0x128   :  { %v102_v43 = vadd.f32 %v101_v41, %v100_v39  ;;  %v88_v44 = vadd.f32 %v87_v42, %v86_v40 }
 0x12a   :  { %v89_v45 = vrot.slane %v88_v44, 1  ;;  %v103_v46 = vrot.slane %v102_v43, 1 }
 0x12c   :  { %v90_v47 = vadd.f32 %v89_v45, %v88_v44  ;;  %v104_v48 = vadd.f32 %v103_v46, %v102_v43 }
 0x12e   :  { %134 = vpush %v90_v47 }
 0x12f   :  { %136 = vpush %v104_v48 }
 0x15f   :  { %s135_s1 = spop %134 }
 0x160   :  { %93 = sst [smem:[#allocation5]] %s135_s1  ;;  %s137_s2 = spop %136 }
 0x161   :  { %107 = sst [smem:[#allocation6]] %s137_s2 }
 0x162   :  { %174 = shalt.err (!%p171_p10)
}
 0x163   :  { %s194_s13 = smov [#allocation5]   ;;  %s175_s18 = scalar_lea.hbm %s267_s4, 16 }
 0x164   :  { %115 = dma.smem_to_hbm %s194_s13, 16, %s266_s3, [#allocation4]  }
 0x165   :  { %p176_p11 = scmp.ne.s32.totalorder %s267_s4, %s175_s18  ;;  %p179_p12 = scmp.lt.u32.totalorder %s175_s18, %s267_s4 }
 0x167   :  { %p181_p13 = pnand %p179_p12, %p176_p11 }
 0x169   :  { %184 = shalt.err (!%p181_p13)
}
 0x16a   :  { %s195_s23 = smov [#allocation6]  }
 0x16b   :  { %123 = dma.smem_to_hbm %s195_s23, 16, %s267_s4, [#allocation7]  }
 0x16c   :  { %187 = dma.done.wait [#allocation4], 16  }
 0x16d   :  { %188 = vsyncadd [#allocation4], 4294967280 }
 0x16e   :  { %189 = dma.done.wait [#allocation7], 16  }
 0x16f   :  { %190 = vsyncadd [#allocation7], 4294967280 }
 0x170   :  { %130 = sfence }
 0x171   :  { %131 = vsyncpa [#allocation3], 1 }
 0x172   :  { %132 = vsyncpa [#allocation4], 1 }
 0x173   :  { %133 = vsyncpa [#allocation7], 1 }

</bundles_post_ra>
